<compile_context>
chip_gen: v6e
topology: v6e:2x2x1
jax: 0.10.0
libtpu: 0.0.40
codegen_flags: <defaults>
</compile_context>

<pallas_src>
import functools

import jax
import jax.numpy as jnp
from jax.experimental import pallas as pl
from jax.experimental.pallas import tpu as pltpu


def _round_up(x, m):
    return ((x + m - 1) // m) * m


def actor_mlp_kernel(x_ref,
                     w1_ref, b1_ref,
                     w2_ref, b2_ref,
                     w3_ref, b3_ref,
                     w4_ref, b4_ref,
                     probs_ref):
    """4-layer MLP + tanh + softmax, fused, for one (TB, K_pad) batch tile.

    Weights are bf16 and VMEM-resident across grid steps, accumulation is f32
    on the MXU, tanh runs in bf16 (value is rounded to bf16 for the next dot
    anyway), softmax exp / reciprocal stay in f32.
    """
    # Layer 1: Linear + Tanh
    x = x_ref[...].astype(jnp.bfloat16)
    h = jnp.dot(x, w1_ref[...], preferred_element_type=jnp.float32) + b1_ref[...]
    h = jnp.tanh(h.astype(jnp.bfloat16))            # bf16 EUP, result already bf16

    # Layer 2: Linear + Tanh
    h = jnp.dot(h, w2_ref[...], preferred_element_type=jnp.float32) + b2_ref[...]
    h = jnp.tanh(h.astype(jnp.bfloat16))

    # Layer 3: Linear + Tanh
    h = jnp.dot(h, w3_ref[...], preferred_element_type=jnp.float32) + b3_ref[...]
    h = jnp.tanh(h.astype(jnp.bfloat16))

    # Layer 4: Linear (lane-padded output; padded lanes carry a -1e30 bias)
    logits = jnp.dot(h, w4_ref[...], preferred_element_type=jnp.float32) + b4_ref[...]

    # Softmax(dim=-1), numerically stable.  Padded lanes -> exp(-huge) == 0,
    # so they do not perturb the normalization of the real lanes.
    m = jnp.max(logits, axis=-1, keepdims=True)
    e = jnp.exp(logits - m)
    denom = jnp.sum(e, axis=-1, keepdims=True)
    # Exact reciprocal (approx=False): rows sum to 1 within ~1e-5.
    probs_ref[...] = e * pl.reciprocal(denom)


@functools.partial(jax.jit, static_argnames=("tile_b",))
def actor_forward(x, params, *, tile_b=512):
    """Run the fused actor MLP kernel. Returns Categorical probabilities (B, out_dim)."""
    (w1, b1), (w2, b2), (w3, b3), (w4, b4) = params
    B, in_dim = x.shape
    out_dim = w4.shape[1]

    # ---- batch tiling -------------------------------------------------------
    # TB rows per grid step (multiple of 8 for sublane alignment, capped at tile_b).
    TB = min(tile_b, _round_up(B, 8))
    B_pad = _round_up(B, TB)
    if B_pad != B:
        x = jnp.pad(x, ((0, B_pad - B), (0, 0)))
    num_tiles = B_pad // TB

    # ---- lane-dense input: pad K of layer 1 to a multiple of 128 (zeros) ----
    K_pad = _round_up(in_dim, 128)
    if K_pad != in_dim:
        x = jnp.pad(x, ((0, 0), (0, K_pad - in_dim)))
        w1 = jnp.pad(w1, ((0, K_pad - in_dim), (0, 0)))

    # ---- lane-dense output: pad the final layer to a multiple of 128 --------
    N_pad = _round_up(out_dim, 128)
    if N_pad != out_dim:
        w4 = jnp.pad(w4, ((0, 0), (0, N_pad - out_dim)))
        # Padded lanes get a very negative bias so softmax assigns them ~0.
        b4 = jnp.pad(b4, ((0, 0), (0, N_pad - out_dim)),
                     constant_values=jnp.float32(-1e30))

    # ---- bf16 weights (halve HBM traffic, native MXU rate); biases stay f32 -
    w1b, w2b, w3b, w4b = (w.astype(jnp.bfloat16) for w in (w1, w2, w3, w4))

    # Activation tiles advance with the grid; weights/biases stay resident and
    # single-buffered (constant index_map -> never re-fetched, no 2nd buffer).
    act_in_spec = pl.BlockSpec((TB, K_pad), lambda i: (i, 0))
    out_spec = pl.BlockSpec((TB, N_pad), lambda i: (i, 0))

    def resident(a):
        ndim = a.ndim
        return pl.BlockSpec(a.shape, lambda i: (0,) * ndim,
                            pipeline_mode=pl.Buffered(1))

    # Megacore sharding only pays off when each core gets enough batch tiles
    # to amortize its own (duplicated) weight DMA; otherwise keep one core.
    dim_sem = ("parallel",) if num_tiles >= 4 else ("arbitrary",)

    probs_pad = pl.pallas_call(
        actor_mlp_kernel,
        out_shape=jax.ShapeDtypeStruct((B_pad, N_pad), jnp.float32),
        grid_spec=pltpu.PrefetchScalarGridSpec(
            num_scalar_prefetch=0,
            grid=(num_tiles,),
            in_specs=[act_in_spec,
                      resident(w1b), resident(b1),
                      resident(w2b), resident(b2),
                      resident(w3b), resident(b3),
                      resident(w4b), resident(b4)],
            out_specs=out_spec,
        ),
        compiler_params=pltpu.CompilerParams(
            dimension_semantics=dim_sem,
            # fc1=fc2=1024, TB=512: ~4.5 MiB single-buffered bf16 weights +
            # double-buffered (TB, K/N) activation tiles + intermediates
            # ~= 12-18 MiB. 32 MiB leaves headroom and fits v7x's 64 MiB VMEM.
            vmem_limit_bytes=32 * 1024 * 1024,
        ),
    )(x, w1b, b1, w2b, b2, w3b, b3, w4b, b4)

    return probs_pad[:B, :out_dim]


def init_params(key, input_dim, fc1_dims, fc2_dims, output_dim):
    """Deterministic init mimicking torch Linear default: U(-1/sqrt(fan_in), 1/sqrt(fan_in))."""
    def linear(k, fan_in, fan_out):
        kw, kb = jax.random.split(k)
        bound = 1.0 / jnp.sqrt(jnp.float32(fan_in))
        w = jax.random.uniform(kw, (fan_in, fan_out), jnp.float32, -bound, bound)
        b = jax.random.uniform(kb, (1, fan_out), jnp.float32, -bound, bound)
        return w, b

    k1, k2, k3, k4 = jax.random.split(key, 4)
    return (linear(k1, input_dim, fc1_dims),
            linear(k2, fc1_dims, fc2_dims),
            linear(k3, fc1_dims, fc2_dims),
            linear(k4, fc2_dims, output_dim))


def _ref_forward_f32(x, params):
    (w1, b1), (w2, b2), (w3, b3), (w4, b4) = params
    h = jnp.tanh(x @ w1 + b1)
    h = jnp.tanh(h @ w2 + b2)
    h = jnp.tanh(h @ w3 + b3)
    return jax.nn.softmax(h @ w4 + b4, axis=-1)


def _ref_forward_bf16(x, params):
    """Same math as the kernel (bf16 operands + bf16 tanh, f32 accumulate/softmax)."""
    (w1, b1), (w2, b2), (w3, b3), (w4, b4) = params
    bf = jnp.bfloat16
    h = jnp.tanh((jnp.dot(x.astype(bf), w1.astype(bf),
                          preferred_element_type=jnp.float32) + b1).astype(bf))
    h = jnp.tanh((jnp.dot(h, w2.astype(bf),
                          preferred_element_type=jnp.float32) + b2).astype(bf))
    h = jnp.tanh((jnp.dot(h, w3.astype(bf),
                          preferred_element_type=jnp.float32) + b3).astype(bf))
    logits = jnp.dot(h, w4.astype(bf),
                     preferred_element_type=jnp.float32) + b4
    return jax.nn.softmax(logits, axis=-1)


if __name__ == "__main__":
    # Small shapes consistent with the module (fc1_dims = fc2_dims; scaled down
    # from the default 1024 to 128 for the synthetic test).  B=256 with
    # tile_b=128 exercises the batched grid (two 128-row tiles).
    B, INPUT_DIM, FC1, FC2, OUTPUT_DIM = 256, 32, 128, 128, 16

    key = jax.random.PRNGKey(0)
    k_x, k_p = jax.random.split(key)
    x = jax.random.normal(k_x, (B, INPUT_DIM), jnp.float32)
    params = init_params(k_p, INPUT_DIM, FC1, FC2, OUTPUT_DIM)

    probs = actor_forward(x, params, tile_b=128)
    probs = jax.block_until_ready(probs)

    assert probs.shape == (B, OUTPUT_DIM), probs.shape

    # Sanity vs a bf16 reference of the same math (tight) and the full f32
    # reference (looser, covers the bf16 weight/tanh quantization).
    ref_bf16 = _ref_forward_bf16(x, params)
    ref_f32 = _ref_forward_f32(x, params)
    assert jnp.allclose(probs, ref_bf16, atol=1e-2, rtol=1e-2), "mismatch vs bf16 reference"
    assert jnp.allclose(probs, ref_f32, atol=3e-2, rtol=3e-2), "mismatch vs f32 reference"
    # Exact reciprocal -> rows sum to 1 to ~1e-5.
    assert jnp.allclose(jnp.sum(probs, axis=-1), 1.0, atol=1e-4), "rows not normalized"

    # TODO(synk): torch.distributions.Categorical wrapper (sampling/log_prob),
    # the Adam optimizer and checkpoint I/O have no Pallas equivalent; the
    # kernel returns the probability matrix that defines the distribution.
    print("KERNEL_OK")
</pallas_src>

<mosaic_0001>
module attributes {stable_mosaic.version = 11 : i64} {
  func.func @actor_mlp_kernel(%arg0: i32, %arg1: memref<128x128xf32, #tpu.memory_space<vmem>>, %arg2: memref<128x128xbf16, #tpu.memory_space<vmem>>, %arg3: memref<1x128xf32, #tpu.memory_space<vmem>>, %arg4: memref<128x128xbf16, #tpu.memory_space<vmem>>, %arg5: memref<1x128xf32, #tpu.memory_space<vmem>>, %arg6: memref<128x128xbf16, #tpu.memory_space<vmem>>, %arg7: memref<1x128xf32, #tpu.memory_space<vmem>>, %arg8: memref<128x128xbf16, #tpu.memory_space<vmem>>, %arg9: memref<1x128xf32, #tpu.memory_space<vmem>>, %arg10: memref<128x128xf32, #tpu.memory_space<vmem>>) attributes {dimension_semantics = [#tpu.dimension_semantics<arbitrary>], iteration_bounds = array<i64: 2>, scalar_prefetch = 0 : i64, scratch_operands = 0 : i64, tpu.core_type = #tpu.core_type<tc>, window_params = [{transform_indices = @transform_0, window_bounds = array<i64: 128, 128>}, {pipeline_mode = #tpu.pipeline_mode<synchronous>, transform_indices = @transform_1, window_bounds = array<i64: 128, 128>}, {pipeline_mode = #tpu.pipeline_mode<synchronous>, transform_indices = @transform_2, window_bounds = array<i64: 1, 128>}, {pipeline_mode = #tpu.pipeline_mode<synchronous>, transform_indices = @transform_3, window_bounds = array<i64: 128, 128>}, {pipeline_mode = #tpu.pipeline_mode<synchronous>, transform_indices = @transform_4, window_bounds = array<i64: 1, 128>}, {pipeline_mode = #tpu.pipeline_mode<synchronous>, transform_indices = @transform_5, window_bounds = array<i64: 128, 128>}, {pipeline_mode = #tpu.pipeline_mode<synchronous>, transform_indices = @transform_6, window_bounds = array<i64: 1, 128>}, {pipeline_mode = #tpu.pipeline_mode<synchronous>, transform_indices = @transform_7, window_bounds = array<i64: 128, 128>}, {pipeline_mode = #tpu.pipeline_mode<synchronous>, transform_indices = @transform_8, window_bounds = array<i64: 1, 128>}, {transform_indices = @transform_9, window_bounds = array<i64: 128, 128>}]} {
    %c0 = arith.constant 0 : index
    %c0_0 = arith.constant 0 : index
    %0 = vector.load %arg1[%c0, %c0_0] : memref<128x128xf32, #tpu.memory_space<vmem>>, vector<128x128xf32>
    %1 = arith.truncf %0 : vector<128x128xf32> to vector<128x128xbf16>
    %c0_1 = arith.constant 0 : index
    %c0_2 = arith.constant 0 : index
    %2 = vector.load %arg2[%c0_1, %c0_2] : memref<128x128xbf16, #tpu.memory_space<vmem>>, vector<128x128xbf16>
    %cst = arith.constant dense<0.000000e+00> : vector<128x128xf32>
    %3 = tpu.matmul %1, %2, %cst {dimension_numbers = #tpu.dot_dimension_numbers<[1], [0], [0], [1], [0, 0, 1, 1], [], []>} : vector<128x128xbf16>, vector<128x128xbf16>, vector<128x128xf32> -> vector<128x128xf32>
    %c0_3 = arith.constant 0 : index
    %c0_4 = arith.constant 0 : index
    %4 = vector.load %arg3[%c0_3, %c0_4] : memref<1x128xf32, #tpu.memory_space<vmem>>, vector<1x128xf32>
    %5 = vector.broadcast %4 : vector<1x128xf32> to vector<128x128xf32>
    %6 = arith.addf %3, %5 : vector<128x128xf32>
    %7 = arith.truncf %6 : vector<128x128xf32> to vector<128x128xbf16>
    %8 = math.tanh %7 : vector<128x128xbf16>
    %c0_5 = arith.constant 0 : index
    %c0_6 = arith.constant 0 : index
    %9 = vector.load %arg4[%c0_5, %c0_6] : memref<128x128xbf16, #tpu.memory_space<vmem>>, vector<128x128xbf16>
    %cst_7 = arith.constant dense<0.000000e+00> : vector<128x128xf32>
    %10 = tpu.matmul %8, %9, %cst_7 {dimension_numbers = #tpu.dot_dimension_numbers<[1], [0], [0], [1], [0, 0, 1, 1], [], []>} : vector<128x128xbf16>, vector<128x128xbf16>, vector<128x128xf32> -> vector<128x128xf32>
    %c0_8 = arith.constant 0 : index
    %c0_9 = arith.constant 0 : index
    %11 = vector.load %arg5[%c0_8, %c0_9] : memref<1x128xf32, #tpu.memory_space<vmem>>, vector<1x128xf32>
    %12 = vector.broadcast %11 : vector<1x128xf32> to vector<128x128xf32>
    %13 = arith.addf %10, %12 : vector<128x128xf32>
    %14 = arith.truncf %13 : vector<128x128xf32> to vector<128x128xbf16>
    %15 = math.tanh %14 : vector<128x128xbf16>
    %c0_10 = arith.constant 0 : index
    %c0_11 = arith.constant 0 : index
    %16 = vector.load %arg6[%c0_10, %c0_11] : memref<128x128xbf16, #tpu.memory_space<vmem>>, vector<128x128xbf16>
    %cst_12 = arith.constant dense<0.000000e+00> : vector<128x128xf32>
    %17 = tpu.matmul %15, %16, %cst_12 {dimension_numbers = #tpu.dot_dimension_numbers<[1], [0], [0], [1], [0, 0, 1, 1], [], []>} : vector<128x128xbf16>, vector<128x128xbf16>, vector<128x128xf32> -> vector<128x128xf32>
    %c0_13 = arith.constant 0 : index
    %c0_14 = arith.constant 0 : index
    %18 = vector.load %arg7[%c0_13, %c0_14] : memref<1x128xf32, #tpu.memory_space<vmem>>, vector<1x128xf32>
    %19 = vector.broadcast %18 : vector<1x128xf32> to vector<128x128xf32>
    %20 = arith.addf %17, %19 : vector<128x128xf32>
    %21 = arith.truncf %20 : vector<128x128xf32> to vector<128x128xbf16>
    %22 = math.tanh %21 : vector<128x128xbf16>
    %c0_15 = arith.constant 0 : index
    %c0_16 = arith.constant 0 : index
    %23 = vector.load %arg8[%c0_15, %c0_16] : memref<128x128xbf16, #tpu.memory_space<vmem>>, vector<128x128xbf16>
    %cst_17 = arith.constant dense<0.000000e+00> : vector<128x128xf32>
    %24 = tpu.matmul %22, %23, %cst_17 {dimension_numbers = #tpu.dot_dimension_numbers<[1], [0], [0], [1], [0, 0, 1, 1], [], []>} : vector<128x128xbf16>, vector<128x128xbf16>, vector<128x128xf32> -> vector<128x128xf32>
    %c0_18 = arith.constant 0 : index
    %c0_19 = arith.constant 0 : index
    %25 = vector.load %arg9[%c0_18, %c0_19] : memref<1x128xf32, #tpu.memory_space<vmem>>, vector<1x128xf32>
    %26 = vector.broadcast %25 : vector<1x128xf32> to vector<128x128xf32>
    %27 = arith.addf %24, %26 : vector<128x128xf32>
    %cst_20 = arith.constant dense<0xFF800000> : vector<128xf32>
    %28 = vector.multi_reduction <maximumf>, %27, %cst_20 [1] : vector<128x128xf32> to vector<128xf32>
    %29 = vector.shape_cast %28 : vector<128xf32> to vector<128x1xf32>
    %30 = vector.broadcast %29 : vector<128x1xf32> to vector<128x128xf32>
    %31 = arith.subf %27, %30 : vector<128x128xf32>
    %32 = math.exp %31 : vector<128x128xf32>
    %cst_21 = arith.constant dense<0.000000e+00> : vector<128xf32>
    %33 = vector.multi_reduction <add>, %32, %cst_21 [1] : vector<128x128xf32> to vector<128xf32>
    %34 = vector.shape_cast %33 : vector<128xf32> to vector<128x1xf32>
    %35 = tpu.reciprocal %34 : vector<128x1xf32> -> vector<128x1xf32>
    %36 = vector.broadcast %35 : vector<128x1xf32> to vector<128x128xf32>
    %37 = arith.mulf %32, %36 : vector<128x128xf32>
    %c0_22 = arith.constant 0 : index
    %c0_23 = arith.constant 0 : index
    %38 = vector.load %arg10[%c0_22, %c0_23] : memref<128x128xf32, #tpu.memory_space<vmem>>, vector<128x128xf32>
    tpu.vector_store %arg10[%c0_22, %c0_23], %37 {strides = array<i32>} : memref<128x128xf32, #tpu.memory_space<vmem>>, vector<128x128xf32>,
    return
  }
  func.func @transform_0(%arg0: i32) -> (i32, i32) {
    %c0_i32 = arith.constant 0 : i32
    %c0_i32_0 = arith.constant 0 : i32
    return %arg0, %c0_i32 : i32, i32
  }
  func.func @transform_1(%arg0: i32) -> (i32, i32) {
    %c0_i32 = arith.constant 0 : i32
    %c0_i32_0 = arith.constant 0 : i32
    %c0_i32_1 = arith.constant 0 : i32
    return %c0_i32, %c0_i32_0 : i32, i32
  }
  func.func @transform_2(%arg0: i32) -> (i32, i32) {
    %c0_i32 = arith.constant 0 : i32
    %c0_i32_0 = arith.constant 0 : i32
    %c0_i32_1 = arith.constant 0 : i32
    return %c0_i32, %c0_i32_0 : i32, i32
  }
  func.func @transform_3(%arg0: i32) -> (i32, i32) {
    %c0_i32 = arith.constant 0 : i32
    %c0_i32_0 = arith.constant 0 : i32
    %c0_i32_1 = arith.constant 0 : i32
    return %c0_i32, %c0_i32_0 : i32, i32
  }
  func.func @transform_4(%arg0: i32) -> (i32, i32) {
    %c0_i32 = arith.constant 0 : i32
    %c0_i32_0 = arith.constant 0 : i32
    %c0_i32_1 = arith.constant 0 : i32
    return %c0_i32, %c0_i32_0 : i32, i32
  }
  func.func @transform_5(%arg0: i32) -> (i32, i32) {
    %c0_i32 = arith.constant 0 : i32
    %c0_i32_0 = arith.constant 0 : i32
    %c0_i32_1 = arith.constant 0 : i32
    return %c0_i32, %c0_i32_0 : i32, i32
  }
  func.func @transform_6(%arg0: i32) -> (i32, i32) {
    %c0_i32 = arith.constant 0 : i32
    %c0_i32_0 = arith.constant 0 : i32
    %c0_i32_1 = arith.constant 0 : i32
    return %c0_i32, %c0_i32_0 : i32, i32
  }
  func.func @transform_7(%arg0: i32) -> (i32, i32) {
    %c0_i32 = arith.constant 0 : i32
    %c0_i32_0 = arith.constant 0 : i32
    %c0_i32_1 = arith.constant 0 : i32
    return %c0_i32, %c0_i32_0 : i32, i32
  }
  func.func @transform_8(%arg0: i32) -> (i32, i32) {
    %c0_i32 = arith.constant 0 : i32
    %c0_i32_0 = arith.constant 0 : i32
    %c0_i32_1 = arith.constant 0 : i32
    return %c0_i32, %c0_i32_0 : i32, i32
  }
  func.func @transform_9(%arg0: i32) -> (i32, i32) {
    %c0_i32 = arith.constant 0 : i32
    %c0_i32_0 = arith.constant 0 : i32
    return %arg0, %c0_i32 : i32, i32
  }
}

</mosaic_0001>

<bundles_post_ra>
// kernel: actor_forward.1
= control target key start
LH: loop header
LB: loop body
LE: loop exit
PB: predicated region body
PF: predicated region fallthrough
CT: control target
= control target key end

     0   :  { %s1746_s30 = smov 0   ;;  %s2006_s0 = inlined_call_operand.vmem [shape: f32[256,128], index: 0, kind: input, shape index: {}]   ;;  %s2007_s1 = inlined_call_operand.vmem [shape: bf16[128,128], index: 1, kind: input, shape index: {}]   ;;  %s2008_s2 = inlined_call_operand.vmem [shape: f32[1,128], index: 2, kind: input, shape index: {}]   ;;  %s2009_s3 = inlined_call_operand.vmem [shape: bf16[128,128], index: 3, kind: input, shape index: {}]   ;;  %s2010_s4 = inlined_call_operand.vmem [shape: f32[1,128], index: 4, kind: input, shape index: {}]   ;;  %s2011_s5 = inlined_call_operand.vmem [shape: bf16[128,128], index: 5, kind: input, shape index: {}]   ;;  %s2012_s6 = inlined_call_operand.vmem [shape: f32[1,128], index: 6, kind: input, shape index: {}]   ;;  %s2013_s7 = inlined_call_operand.vmem [shape: bf16[128,128], index: 7, kind: input, shape index: {}]   ;;  %s2014_s8 = inlined_call_operand.vmem [shape: f32[1,128], index: 8, kind: input, shape index: {}]   ;;  %s2015_s9 = inlined_call_operand.vmem [shape: f32[256,128], index: 9, kind: output, shape index: {}]  }
   0x1 LB: > { %s1297_s10 = sadd.s32 4294967295, %s1694_s30   ;;  %p1301_p0 = scmp.ge.s32.totalorder %s1694_s30, 1  ;;  %s1694_s30 = sphi %s1746_s30, %s19_s30  }
   0x2   : > { %p288_p1 = scmp.lt.s32.totalorder %s1694_s30, 3 }
   0x4   : > { %p289_p2 = pnand %p1301_p0, %p288_p1 }
   0x5   : > { %s1302_s13 = sshll.u32 (!%p289_p2), %s1297_s10, 4 }
   0x6   : > { %292 = sbr.rel (%p289_p2) target bundleno = 1241 (0x4d9), region = 56  ;;  %p325_p3 = scmp.lt.s32.totalorder (!%p289_p2), %s1302_s13, 31 }
   0xb   : > { %v1544_v0 = vld [vmem:[%s2007_s1 + $0x38] sm:$0xff]   ;;  %v1545_v1 = vld [vmem:[%s2007_s1 + $0x30] sm:$0xff]   ;;  %s2017_s13 = smov (!%p325_p3, %s1302_s13), 31  ;;  %v1546_v2 = vld [vmem:[%s2007_s1 + $0x28] sm:$0xff]  }
   0xc   : > { %1408 = vmatprep.subr.bf16.mxu0 %v1544_v0  ;;  %s1303_s18 = sshll.u32 %s2017_s13, 3  ;;  %v1547_v3 = vld [vmem:[%s2007_s1 + $0x20] sm:$0xff]   ;;  %v1548_v7 = vld [vmem:[%s2007_s1 + $0x18] sm:$0xff]   ;;  %v1549_v8 = vld [vmem:[%s2007_s1 + $0x10] sm:$0xff]  }
   0xd   : > { %1409 = vmatpush3.bf16.msra.mxu0 %v1544_v0  ;;  %s1771_s21 = scalar_lea.vmem %s2006_s0, %s1303_s18  ;;  %v1552_v9 = vld [vmem:[%s2009_s3 + $0x38] sm:$0xff]   ;;  %v1553_v10 = vld [vmem:[%s2009_s3 + $0x30] sm:$0xff]   ;;  %v1550_v11 = vld [vmem:[%s2007_s1 + $0x8] sm:$0xff]   ;;  %s1969_s17 = scalar_lea.vmem %s2015_s9, %s1303_s18 }
   0xe   : > { %1410 = vmatprep.subr.bf16.mxu0 %v1545_v1  ;;  %v337_v4 = vld [vmem:[%s1771_s21] sm:$0xff]  ;;  %v338_v5 = vld [vmem:[%s1771_s21 + $0x8] sm:$0xff]  ;;  %1440 = vmatprep.subr.bf16.mxu1 %v1552_v9  ;;  %v339_v13 = vld [vmem:[%s1771_s21 + $0x10] sm:$0xff] }
   0xf   : > { %v353_v6 = vpack.c.bf16 %v338_v5, %v337_v4  ;;  %1441 = vmatpush3.bf16.msra.mxu1 %v1552_v9  ;;  %v1551_v12 = vld [vmem:[%s2007_s1] sm:$0xff]   ;;  %v340_v14 = vld [vmem:[%s1771_s21 + $0x18] sm:$0xff]  ;;  %v342_v16 = vld [vmem:[%s1771_s21 + $0x28] sm:$0xff] }
  0x10   : > { %1442 = vmatprep.subr.bf16.mxu1 %v1553_v10  ;;  %v341_v15 = vld [vmem:[%s1771_s21 + $0x20] sm:$0xff]  ;;  %v354_v17 = vpack.c.bf16 %v340_v14, %v339_v13  ;;  %v343_v19 = vld [vmem:[%s1771_s21 + $0x30] sm:$0xff]  ;;  %v344_v20 = vld [vmem:[%s1771_s21 + $0x38] sm:$0xff] }
  0x11   : > { %1411 = vmatpush3.bf16.msra.mxu0 %v1545_v1  ;;  %1424 = vmatprep.mubr.bf16.mxu0 %v353_v6  ;;  %v355_v18 = vpack.c.bf16 %v342_v16, %v341_v15  ;;  %v345_v21 = vld [vmem:[%s1771_s21 + $0x40] sm:$0xff]  ;;  %v346_v22 = vld [vmem:[%s1771_s21 + $0x48] sm:$0xff]  ;;  %v356_v23 = vpack.c.bf16 %v344_v20, %v343_v19  ;;  %v347_v25 = vld [vmem:[%s1771_s21 + $0x50] sm:$0xff] }
  0x12   : > { %1412 = vmatprep.subr.bf16.mxu0 %v1546_v2  ;;  %v357_v24 = vpack.c.bf16 %v346_v22, %v345_v21  ;;  %v348_v26 = vld [vmem:[%s1771_s21 + $0x58] sm:$0xff]  ;;  %v349_v27 = vld [vmem:[%s1771_s21 + $0x60] sm:$0xff]  ;;  %v350_v28 = vld [vmem:[%s1771_s21 + $0x68] sm:$0xff] }
  0x13   : > { %1443 = vmatpush3.bf16.msra.mxu1 %v1553_v10  ;;  %v358_v29 = vpack.c.bf16 %v348_v26, %v347_v25  ;;  %v359_v30 = vpack.c.bf16 %v350_v28, %v349_v27  ;;  %v351_v31 = vld [vmem:[%s1771_s21 + $0x70] sm:$0xff]  ;;  %v352_v32 = vld [vmem:[%s1771_s21 + $0x78] sm:$0xff]  ;;  %v1554_v34 = vld [vmem:[%s2009_s3 + $0x28] sm:$0xff]  }
  0x14   : > { %v360_v33 = vpack.c.bf16 %v352_v32, %v351_v31  ;;  %1444 = vmatprep.subr.bf16.mxu1 %v1554_v34  ;;  %v1555_v35 = vld [vmem:[%s2009_s3 + $0x20] sm:$0xff]   ;;  %v1556_v36 = vld [vmem:[%s2009_s3 + $0x18] sm:$0xff]   ;;  %v1557_v37 = vld [vmem:[%s2009_s3 + $0x10] sm:$0xff]  }
  0x15   : > { %1413 = vmatpush3.bf16.msra.mxu0 %v1546_v2  ;;  %v1558_v38 = vld [vmem:[%s2009_s3 + $0x8] sm:$0xff]   ;;  %v1559_v39 = vld [vmem:[%s2009_s3] sm:$0xff]   ;;  %v1560_v40 = vld [vmem:[%s2011_s5 + $0x38] sm:$0xff]  }
  0x16   : > { %1414 = vmatprep.subr.bf16.mxu0 %v1547_v3  ;;  %v1561_v41 = vld [vmem:[%s2011_s5 + $0x30] sm:$0xff]   ;;  %v1306_v44 = vld [vmem:[%s2008_s2] ss:$0 sm:$0xff]  ;;  %v1562_v27 = vld [vmem:[%s2011_s5 + $0x28] sm:$0xff]  }
  0x17   : > { %1445 = vmatpush3.bf16.msra.mxu1 %v1554_v34  ;;  %v1563_v28 = vld [vmem:[%s2011_s5 + $0x20] sm:$0xff]   ;;  %v1566_v31 = vld [vmem:[%s2011_s5 + $0x8] sm:$0xff]   ;;  %v1569_v34 = vld [vmem:[%s2013_s7 + $0x30] sm:$0xff]  }
  0x18   : > { %1446 = vmatprep.subr.bf16.mxu1 %v1555_v35  ;;  %v1567_v32 = vld [vmem:[%s2011_s5] sm:$0xff]  }
  0x19   : > { %1415 = vmatpush3.bf16.msra.mxu0 %v1547_v3 }
  0x1a   : > { %1416 = vmatprep.subr.bf16.mxu0 %v1548_v7 }
  0x1b   : > { %1447 = vmatpush3.bf16.msra.mxu1 %v1555_v35 }
  0x1c   : > { %1448 = vmatprep.subr.bf16.mxu1 %v1556_v36 }
  0x1d   : > { %1417 = vmatpush3.bf16.msra.mxu0 %v1548_v7 }
  0x1e   : > { %1418 = vmatprep.subr.bf16.mxu0 %v1549_v8 }
  0x1f   : > { %1449 = vmatpush3.bf16.msra.mxu1 %v1556_v36 }
  0x20   : > { %1450 = vmatprep.subr.bf16.mxu1 %v1557_v37 }
  0x21   : > { %1419 = vmatpush3.bf16.msra.mxu0 %v1549_v8 }
  0x22   : > { %1420 = vmatprep.subr.bf16.mxu0 %v1550_v11 }
  0x23   : > { %1451 = vmatpush3.bf16.msra.mxu1 %v1557_v37  ;;  %v1315_v37 = vld [vmem:[%s2010_s4] ss:$0 sm:$0xff] }
  0x24   : > { %1452 = vmatprep.subr.bf16.mxu1 %v1558_v38 }
  0x25   : > { %1421 = vmatpush3.bf16.msra.mxu0 %v1550_v11 }
  0x26   : > { %1422 = vmatprep.subr.bf16.mxu0 %v1551_v12 }
  0x27   : > { %1453 = vmatpush3.bf16.msra.mxu1 %v1558_v38 }
  0x28   : > { %1454 = vmatprep.subr.bf16.mxu1 %v1559_v39 }
  0x29   : > { %1423 = vmatpush3.bf16.msra.mxu0 %v1551_v12 }
  0x2a   : > { %1472 = vmatprep.subr.bf16.mxu0 %v1560_v40 }
  0x2b   : > { %1455 = vmatpush3.bf16.msra.mxu1 %v1559_v39 }
  0x2c   : > { %1425 = vmatmul.mubr.bf16.vlgmr.msra.gmra.mxu0 %v354_v17 }
  0x2d   : > { %1428 = vmatprep.mubr.bf16.mxu0 %v355_v18  ;;  %1473 = vmatpush3.bf16.msra.mxu0 %v1560_v40 }
  0x2e   : > { %1474 = vmatprep.subr.bf16.mxu0 %v1561_v41 }
  0x31   : > { %1475 = vmatpush3.bf16.msra.mxu0 %v1561_v41 }
  0x32   : > { %1476 = vmatprep.subr.bf16.mxu0 %v1562_v27 }
  0x34   : > { %1429 = vmatmul.mubr.bf16.gmra.mxu0 %v356_v23 }
  0x35   : > { %1432 = vmatprep.mubr.bf16.mxu0 %v357_v24  ;;  %1477 = vmatpush3.bf16.msra.mxu0 %v1562_v27 }
  0x36   : > { %1478 = vmatprep.subr.bf16.mxu0 %v1563_v28 }
  0x39   : > { %1479 = vmatpush3.bf16.msra.mxu0 %v1563_v28  ;;  %v1324_v28 = vld [vmem:[%s2012_s6] ss:$0 sm:$0xff] }
  0x3c   : > { %1433 = vmatmul.mubr.bf16.gmra.mxu0 %v358_v29  ;;  %v1564_v29 = vld [vmem:[%s2011_s5 + $0x18] sm:$0xff]  }
  0x3d   : > { %1436 = vmatprep.mubr.bf16.mxu0 %v359_v30  ;;  %1480 = vmatprep.subr.bf16.mxu0 %v1564_v29  ;;  %v1565_v30 = vld [vmem:[%s2011_s5 + $0x10] sm:$0xff]  }
  0x3e   : > { %1481 = vmatpush3.bf16.msra.mxu0 %v1564_v29 }
  0x3f   : > { %1482 = vmatprep.subr.bf16.mxu0 %v1565_v30 }
  0x42   : > { %1483 = vmatpush3.bf16.msra.mxu0 %v1565_v30 }
  0x43   : > { %1484 = vmatprep.subr.bf16.mxu0 %v1566_v31 }
  0x44   : > { %1437 = vmatmul.mubr.bf16.gmra.mxu0 %v360_v33  ;;  %v1568_v33 = vld [vmem:[%s2013_s7 + $0x38] sm:$0xff]  }
  0x45   : > { %1504 = vmatprep.subr.bf16.mxu1 %v1568_v33 }
  0x46   : > { %1485 = vmatpush3.bf16.msra.mxu0 %v1566_v31 }
  0x47   : > { %1486 = vmatprep.subr.bf16.mxu0 %v1567_v32 }
  0x4a   : > { %1487 = vmatpush3.bf16.msra.mxu0 %v1567_v32 }
  0xec   : > { %v1426_v42 = vpop.f32.mrf.mxu0 }
  0xed   : > { %v475_v47 = vadd.f32 %v1426_v42, %v1306_v44 }
  0xee   : > { %v466_v43 = vpop.f32.mrf.mxu0 }
  0xef   : > { %v467_v49 = vadd.f32 %v1306_v44, %v466_v43 }
  0xf0   : > { %v1427_v45 = vpop.f32.mrf.mxu0 }
  0xf1   : > { %v478_v46 = vadd.f32 %v1427_v45, %v1306_v44 }
  0xf2   : > { %v469_v48 = vpop.f32.mrf.mxu0 }
  0xf3   : > { %v470_v50 = vadd.f32 %v1306_v44, %v469_v48  ;;  %v530_v51 = vpack.c.bf16 %v478_v46, %v475_v47 }
  0xf4   : > { %v1430_v52 = vpop.f32.mrf.mxu0 }
  0xf5   : > { %v529_v53 = vpack.c.bf16 %v470_v50, %v467_v49  ;;  %v491_v57 = vadd.f32 %v1430_v52, %v1306_v44 }
  0xf6   : > { %v482_v54 = vpop.f32.mrf.mxu0 }
  0xf7   : > { %1576 = vtanh.bf16 %v529_v53  ;;  %v483_v59 = vadd.f32 %v1306_v44, %v482_v54 }
  0xf8   : > { %1578 = vtanh.bf16 %v530_v51  ;;  %v1431_v55 = vpop.f32.mrf.mxu0 }
  0xf9   : > { %v494_v56 = vadd.f32 %v1431_v55, %v1306_v44 }
  0xfa   : > { %v485_v58 = vpop.f32.mrf.mxu0 }
  0xfb   : > { %v486_v60 = vadd.f32 %v1306_v44, %v485_v58  ;;  %v532_v61 = vpack.c.bf16 %v494_v56, %v491_v57 }
  0xfc   : > { %v1434_v62 = vpop.f32.mrf.mxu0 }
  0xfd   : > { %v531_v63 = vpack.c.bf16 %v486_v60, %v483_v59  ;;  %v507_v3 = vadd.f32 %v1434_v62, %v1306_v44 }
  0xfe   : > { %v498_v0 = vpop.f32.mrf.mxu0 }
  0xff   : > { %1580 = vtanh.bf16 %v531_v63  ;;  %v499_v5 = vadd.f32 %v1306_v44, %v498_v0 }
 0x100   : > { %1582 = vtanh.bf16 %v532_v61  ;;  %v1435_v1 = vpop.f32.mrf.mxu0 }
 0x101   : > { %v510_v2 = vadd.f32 %v1435_v1, %v1306_v44 }
 0x102   : > { %v501_v4 = vpop.f32.mrf.mxu0 }
 0x103   : > { %v502_v6 = vadd.f32 %v1306_v44, %v501_v4  ;;  %v534_v7 = vpack.c.bf16 %v510_v2, %v507_v3 }
 0x104   : > { %v1438_v8 = vpop.f32.mrf.mxu0 }
 0x105   : > { %v1577_v9 = vpop.eup %1576  ;;  %v533_v10 = vpack.c.bf16 %v502_v6, %v499_v5  ;;  %v523_v15 = vadd.f32 %v1438_v8, %v1306_v44 }
 0x106   : > { %v1579_v11 = vpop.eup %1578  ;;  %v514_v12 = vpop.f32.mrf.mxu0  ;;  %1456 = vmatprep.mubr.bf16.mxu1 %v1577_v9 }
 0x107   : > { %1584 = vtanh.bf16 %v533_v10  ;;  %1457 = vmatmul.mubr.bf16.vlgmr.msra.gmra.mxu1 %v1579_v11  ;;  %v515_v17 = vadd.f32 %v1306_v44, %v514_v12 }
 0x108   : > { %1586 = vtanh.bf16 %v534_v7  ;;  %v1439_v13 = vpop.f32.mrf.mxu0  ;;  %1505 = vmatpush3.bf16.msra.mxu1 %v1568_v33 }
 0x109   : > { %v526_v14 = vadd.f32 %v1439_v13, %v1306_v44  ;;  %1506 = vmatprep.subr.bf16.mxu1 %v1569_v34 }
 0x10a   : > { %v517_v16 = vpop.f32.mrf.mxu0 }
 0x10b   : > { %v518_v18 = vadd.f32 %v1306_v44, %v517_v16  ;;  %v536_v19 = vpack.c.bf16 %v526_v14, %v523_v15 }
 0x10c   : > { %1507 = vmatpush3.bf16.msra.mxu1 %v1569_v34 }
 0x10d   : > { %v1581_v20 = vpop.eup %1580  ;;  %v535_v21 = vpack.c.bf16 %v518_v18, %v515_v17 }
 0x10e   : > { %v1583_v22 = vpop.eup %1582  ;;  %1460 = vmatprep.mubr.bf16.mxu1 %v1581_v20  ;;  %v1570_v20 = vld [vmem:[%s2013_s7 + $0x28] sm:$0xff]  }
 0x10f   : > { %1588 = vtanh.bf16 %v535_v21  ;;  %1461 = vmatmul.mubr.bf16.gmra.mxu1 %v1583_v22  ;;  %1508 = vmatprep.subr.bf16.mxu1 %v1570_v20  ;;  %v1571_v21 = vld [vmem:[%s2013_s7 + $0x20] sm:$0xff]   ;;  %v1572_v22 = vld [vmem:[%s2013_s7 + $0x18] sm:$0xff]  }
 0x110   : > { %1590 = vtanh.bf16 %v536_v19  ;;  %1509 = vmatpush3.bf16.msra.mxu1 %v1570_v20 }
 0x111   : > { %1510 = vmatprep.subr.bf16.mxu1 %v1571_v21 }
 0x114   : > { %1511 = vmatpush3.bf16.msra.mxu1 %v1571_v21 }
 0x115   : > { %v1585_v23 = vpop.eup %1584  ;;  %1512 = vmatprep.subr.bf16.mxu1 %v1572_v22 }
 0x116   : > { %v1587_v24 = vpop.eup %1586  ;;  %1464 = vmatprep.mubr.bf16.mxu1 %v1585_v23  ;;  %v1573_v23 = vld [vmem:[%s2013_s7 + $0x10] sm:$0xff]  }
 0x117   : > { %1465 = vmatmul.mubr.bf16.gmra.mxu1 %v1587_v24  ;;  %v1574_v24 = vld [vmem:[%s2013_s7 + $0x8] sm:$0xff]  }
 0x118   : > { %1513 = vmatpush3.bf16.msra.mxu1 %v1572_v22 }
 0x119   : > { %1514 = vmatprep.subr.bf16.mxu1 %v1573_v23 }
 0x11c   : > { %1515 = vmatpush3.bf16.msra.mxu1 %v1573_v23 }
 0x11d   : > { %v1589_v25 = vpop.eup %1588  ;;  %1516 = vmatprep.subr.bf16.mxu1 %v1574_v24 }
 0x11e   : > { %v1591_v26 = vpop.eup %1590  ;;  %1468 = vmatprep.mubr.bf16.mxu1 %v1589_v25  ;;  %v1575_v25 = vld [vmem:[%s2013_s7] sm:$0xff]  }
 0x11f   : > { %1469 = vmatmul.mubr.bf16.gmra.mxu1 %v1591_v26 }
 0x120   : > { %1517 = vmatpush3.bf16.msra.mxu1 %v1574_v24 }
 0x121   : > { %1518 = vmatprep.subr.bf16.mxu1 %v1575_v25 }
 0x124   : > { %1519 = vmatpush3.bf16.msra.mxu1 %v1575_v25 }
 0x1c7   : > { %v1458_v35 = vpop.f32.mrf.mxu1 }
 0x1c8   : > { %v659_v40 = vadd.f32 %v1458_v35, %v1315_v37 }
 0x1c9   : > { %v650_v36 = vpop.f32.mrf.mxu1 }
 0x1ca   : > { %v651_v42 = vadd.f32 %v1315_v37, %v650_v36 }
 0x1cb   : > { %v1459_v38 = vpop.f32.mrf.mxu1 }
 0x1cc   : > { %v662_v39 = vadd.f32 %v1459_v38, %v1315_v37 }
 0x1cd   : > { %v653_v41 = vpop.f32.mrf.mxu1 }
 0x1ce   : > { %v654_v43 = vadd.f32 %v1315_v37, %v653_v41  ;;  %v714_v44 = vpack.c.bf16 %v662_v39, %v659_v40 }
 0x1cf   : > { %v1462_v45 = vpop.f32.mrf.mxu1 }
 0x1d0   : > { %v713_v46 = vpack.c.bf16 %v654_v43, %v651_v42  ;;  %v675_v50 = vadd.f32 %v1462_v45, %v1315_v37 }
 0x1d1   : > { %v666_v47 = vpop.f32.mrf.mxu1 }
 0x1d2   : > { %1592 = vtanh.bf16 %v713_v46  ;;  %v667_v52 = vadd.f32 %v1315_v37, %v666_v47 }
 0x1d3   : > { %1594 = vtanh.bf16 %v714_v44  ;;  %v1463_v48 = vpop.f32.mrf.mxu1 }
 0x1d4   : > { %v678_v49 = vadd.f32 %v1463_v48, %v1315_v37 }
 0x1d5   : > { %v669_v51 = vpop.f32.mrf.mxu1 }
 0x1d6   : > { %v670_v53 = vadd.f32 %v1315_v37, %v669_v51  ;;  %v716_v54 = vpack.c.bf16 %v678_v49, %v675_v50 }
 0x1d7   : > { %v1466_v55 = vpop.f32.mrf.mxu1 }
 0x1d8   : > { %v715_v56 = vpack.c.bf16 %v670_v53, %v667_v52  ;;  %v691_v60 = vadd.f32 %v1466_v55, %v1315_v37 }
 0x1d9   : > { %v682_v57 = vpop.f32.mrf.mxu1 }
 0x1da   : > { %1596 = vtanh.bf16 %v715_v56  ;;  %v683_v62 = vadd.f32 %v1315_v37, %v682_v57 }
 0x1db   : > { %1598 = vtanh.bf16 %v716_v54  ;;  %v1467_v58 = vpop.f32.mrf.mxu1 }
 0x1dc   : > { %v694_v59 = vadd.f32 %v1467_v58, %v1315_v37 }
 0x1dd   : > { %v685_v61 = vpop.f32.mrf.mxu1 }
 0x1de   : > { %v686_v63 = vadd.f32 %v1315_v37, %v685_v61  ;;  %v718_v0 = vpack.c.bf16 %v694_v59, %v691_v60 }
 0x1df   : > { %v1470_v1 = vpop.f32.mrf.mxu1 }
 0x1e0   : > { %v1593_v2 = vpop.eup %1592  ;;  %v717_v3 = vpack.c.bf16 %v686_v63, %v683_v62  ;;  %v707_v8 = vadd.f32 %v1470_v1, %v1315_v37 }
 0x1e1   : > { %v1595_v4 = vpop.eup %1594  ;;  %v698_v5 = vpop.f32.mrf.mxu1  ;;  %1488 = vmatprep.mubr.bf16.mxu0 %v1593_v2 }
 0x1e2   : > { %1600 = vtanh.bf16 %v717_v3  ;;  %1489 = vmatmul.mubr.bf16.vlgmr.msra.gmra.mxu0 %v1595_v4  ;;  %v699_v10 = vadd.f32 %v1315_v37, %v698_v5 }
 0x1e3   : > { %1602 = vtanh.bf16 %v718_v0  ;;  %v1471_v6 = vpop.f32.mrf.mxu1 }
 0x1e4   : > { %v710_v7 = vadd.f32 %v1471_v6, %v1315_v37 }
 0x1e5   : > { %v701_v9 = vpop.f32.mrf.mxu1 }
 0x1e6   : > { %v702_v11 = vadd.f32 %v1315_v37, %v701_v9  ;;  %v720_v12 = vpack.c.bf16 %v710_v7, %v707_v8 }
 0x1e8   : > { %v1597_v13 = vpop.eup %1596  ;;  %v719_v14 = vpack.c.bf16 %v702_v11, %v699_v10  ;;  %v1333_v11 = vld [vmem:[%s2014_s8] ss:$0 sm:$0xff] }
 0x1e9   : > { %v1599_v15 = vpop.eup %1598  ;;  %1492 = vmatprep.mubr.bf16.mxu0 %v1597_v13 }
 0x1ea   : > { %1604 = vtanh.bf16 %v719_v14  ;;  %1493 = vmatmul.mubr.bf16.gmra.mxu0 %v1599_v15 }
 0x1eb   : > { %1606 = vtanh.bf16 %v720_v12 }
 0x1f0   : > { %v1601_v16 = vpop.eup %1600 }
 0x1f1   : > { %v1603_v17 = vpop.eup %1602  ;;  %1496 = vmatprep.mubr.bf16.mxu0 %v1601_v16 }
 0x1f2   : > { %1497 = vmatmul.mubr.bf16.gmra.mxu0 %v1603_v17 }
 0x1f8   : > { %v1605_v18 = vpop.eup %1604 }
 0x1f9   : > { %v1607_v19 = vpop.eup %1606  ;;  %1500 = vmatprep.mubr.bf16.mxu0 %v1605_v18 }
 0x1fa   : > { %1501 = vmatmul.mubr.bf16.gmra.mxu0 %v1607_v19 }
 0x2a2   : > { %v1490_v26 = vpop.f32.mrf.mxu0 }
 0x2a3   : > { %v843_v31 = vadd.f32 %v1490_v26, %v1324_v28 }
 0x2a4   : > { %v834_v27 = vpop.f32.mrf.mxu0 }
 0x2a5   : > { %v835_v33 = vadd.f32 %v1324_v28, %v834_v27 }
 0x2a6   : > { %v1491_v29 = vpop.f32.mrf.mxu0 }
 0x2a7   : > { %v846_v30 = vadd.f32 %v1491_v29, %v1324_v28 }
 0x2a8   : > { %v837_v32 = vpop.f32.mrf.mxu0 }
 0x2a9   : > { %v838_v34 = vadd.f32 %v1324_v28, %v837_v32  ;;  %v898_v35 = vpack.c.bf16 %v846_v30, %v843_v31 }
 0x2aa   : > { %v1494_v36 = vpop.f32.mrf.mxu0 }
 0x2ab   : > { %v897_v37 = vpack.c.bf16 %v838_v34, %v835_v33  ;;  %v859_v41 = vadd.f32 %v1494_v36, %v1324_v28 }
 0x2ac   : > { %v850_v38 = vpop.f32.mrf.mxu0 }
 0x2ad   : > { %1608 = vtanh.bf16 %v897_v37  ;;  %v851_v43 = vadd.f32 %v1324_v28, %v850_v38 }
 0x2ae   : > { %1610 = vtanh.bf16 %v898_v35  ;;  %v1495_v39 = vpop.f32.mrf.mxu0 }
 0x2af   : > { %v862_v40 = vadd.f32 %v1495_v39, %v1324_v28 }
 0x2b0   : > { %v853_v42 = vpop.f32.mrf.mxu0 }
 0x2b1   : > { %v854_v44 = vadd.f32 %v1324_v28, %v853_v42  ;;  %v900_v45 = vpack.c.bf16 %v862_v40, %v859_v41 }
 0x2b2   : > { %v1498_v46 = vpop.f32.mrf.mxu0 }
 0x2b3   : > { %v899_v47 = vpack.c.bf16 %v854_v44, %v851_v43  ;;  %v875_v51 = vadd.f32 %v1498_v46, %v1324_v28 }
 0x2b4   : > { %v866_v48 = vpop.f32.mrf.mxu0 }
 0x2b5   : > { %1612 = vtanh.bf16 %v899_v47  ;;  %v867_v53 = vadd.f32 %v1324_v28, %v866_v48 }
 0x2b6   : > { %1614 = vtanh.bf16 %v900_v45  ;;  %v1499_v49 = vpop.f32.mrf.mxu0 }
 0x2b7   : > { %v878_v50 = vadd.f32 %v1499_v49, %v1324_v28 }
 0x2b8   : > { %v869_v52 = vpop.f32.mrf.mxu0 }
 0x2b9   : > { %v870_v54 = vadd.f32 %v1324_v28, %v869_v52  ;;  %v902_v55 = vpack.c.bf16 %v878_v50, %v875_v51 }
 0x2ba   : > { %v1502_v56 = vpop.f32.mrf.mxu0 }
 0x2bb   : > { %v1609_v57 = vpop.eup %1608  ;;  %v901_v58 = vpack.c.bf16 %v870_v54, %v867_v53  ;;  %v891_v63 = vadd.f32 %v1502_v56, %v1324_v28 }
 0x2bc   : > { %v1611_v59 = vpop.eup %1610  ;;  %v882_v60 = vpop.f32.mrf.mxu0  ;;  %1520 = vmatprep.mubr.bf16.mxu1 %v1609_v57 }
 0x2bd   : > { %1616 = vtanh.bf16 %v901_v58  ;;  %1521 = vmatmul.mubr.bf16.vlgmr.msra.gmra.mxu1 %v1611_v59  ;;  %v883_v1 = vadd.f32 %v1324_v28, %v882_v60 }
 0x2be   : > { %1618 = vtanh.bf16 %v902_v55  ;;  %v1503_v61 = vpop.f32.mrf.mxu0 }
 0x2bf   : > { %v894_v62 = vadd.f32 %v1503_v61, %v1324_v28 }
 0x2c0   : > { %v885_v0 = vpop.f32.mrf.mxu0 }
 0x2c1   : > { %v886_v2 = vadd.f32 %v1324_v28, %v885_v0  ;;  %v904_v3 = vpack.c.bf16 %v894_v62, %v891_v63 }
 0x2c3   : > { %v1613_v4 = vpop.eup %1612  ;;  %v903_v5 = vpack.c.bf16 %v886_v2, %v883_v1 }
 0x2c4   : > { %v1615_v6 = vpop.eup %1614  ;;  %1524 = vmatprep.mubr.bf16.mxu1 %v1613_v4 }
 0x2c5   : > { %1620 = vtanh.bf16 %v903_v5  ;;  %1525 = vmatmul.mubr.bf16.gmra.mxu1 %v1615_v6 }
 0x2c6   : > { %1622 = vtanh.bf16 %v904_v3 }
 0x2cb   : > { %v1617_v7 = vpop.eup %1616 }
 0x2cc   : > { %v1619_v8 = vpop.eup %1618  ;;  %1528 = vmatprep.mubr.bf16.mxu1 %v1617_v7 }
 0x2cd   : > { %1529 = vmatmul.mubr.bf16.gmra.mxu1 %v1619_v8 }
 0x2d3   : > { %v1621_v9 = vpop.eup %1620 }
 0x2d4   : > { %v1623_v10 = vpop.eup %1622  ;;  %1532 = vmatprep.mubr.bf16.mxu1 %v1621_v9 }
 0x2d5   : > { %1533 = vmatmul.mubr.bf16.gmra.mxu1 %v1623_v10 }
 0x37d   : > { %v1522_v12 = vpop.f32.mrf.mxu1 }
 0x37e   : > { %v1027_v13 = vadd.f32 %v1522_v12, %v1333_v11 }
 0x37f   : > { %v1018_v14 = vpop.f32.mrf.mxu1 }
 0x380   : > { %v1019_v15 = vadd.f32 %v1333_v11, %v1018_v14  ;;  %1085 = vmax.xlane.f32.xlu1 %v1027_v13 }
 0x381   : > { %v1523_v16 = vpop.f32.mrf.mxu1 }
 0x382   : > { %v1030_v17 = vadd.f32 %v1523_v16, %v1333_v11  ;;  %1081 = vmax.xlane.f32.xlu0 %v1019_v15 }
 0x383   : > { %v1021_v18 = vpop.f32.mrf.mxu1 }
 0x384   : > { %v1022_v19 = vadd.f32 %v1333_v11, %v1021_v18  ;;  %1087 = vmax.xlane.f32.xlu1 %v1030_v17 }
 0x385   : > { %v1526_v20 = vpop.f32.mrf.mxu1 }
 0x386   : > { %1083 = vmax.xlane.f32.xlu0 %v1022_v19  ;;  %v1043_v22 = vadd.f32 %v1526_v20, %v1333_v11 }
 0x387   : > { %v1034_v21 = vpop.f32.mrf.mxu1 }
 0x388   : > { %v1035_v26 = vadd.f32 %v1333_v11, %v1034_v21 }
 0x389   : > { %v1527_v23 = vpop.f32.mrf.mxu1 }
 0x38a   : > { %v1046_v24 = vadd.f32 %v1527_v23, %v1333_v11  ;;  %1093 = vmax.xlane.f32.xlu0 %v1043_v22 }
 0x38b   : > { %v1037_v25 = vpop.f32.mrf.mxu1 }
 0x38c   : > { %1095 = vmax.xlane.f32.xlu1 %v1046_v24  ;;  %v1038_v28 = vadd.f32 %v1333_v11, %v1037_v25 }
 0x38d   : > { %v1530_v27 = vpop.f32.mrf.mxu1 }
 0x38e   : > { %1089 = vmax.xlane.f32.xlu0 %v1035_v26  ;;  %v1059_v30 = vadd.f32 %v1530_v27, %v1333_v11 }
 0x38f   : > { %v1050_v29 = vpop.f32.mrf.mxu1 }
 0x390   : > { %1091 = vmax.xlane.f32.xlu1 %v1038_v28  ;;  %v1890_v34 = vadd.f32 %v1333_v11, %v1050_v29 }
 0x391   : > { %v1531_v31 = vpop.f32.mrf.mxu1 }
 0x392   : > { %v1888_v32 = vadd.f32 %v1531_v31, %v1333_v11  ;;  %1101 = vmax.xlane.f32.xlu0 %v1059_v30 }
 0x393   : > { %v1053_v33 = vpop.f32.mrf.mxu1 }
 0x394   : > { %1103 = vmax.xlane.f32.xlu1 %v1888_v32  ;;  %v1893_v36 = vadd.f32 %v1333_v11, %v1053_v33 }
 0x395   : > { %v1534_v35 = vpop.f32.mrf.mxu1 }
 0x396   : > { %1097 = vmax.xlane.f32.xlu0 %v1890_v34  ;;  %v1900_v41 = vadd.f32 %v1534_v35, %v1333_v11 }
 0x397   : > { %v1066_v37 = vpop.f32.mrf.mxu1 }
 0x398   : > { %v1896_v38 = vadd.f32 %v1333_v11, %v1066_v37  ;;  %1099 = vmax.xlane.f32.xlu1 %v1893_v36 }
 0x399   : > { %v1535_v39 = vpop.f32.mrf.mxu1 }
 0x39a   : > { %1105 = vmax.xlane.f32.xlu0 %v1896_v38  ;;  %v1906_v43 = vadd.f32 %v1535_v39, %v1333_v11 }
 0x39b   : > { %v1069_v40 = vpop.f32.mrf.mxu1 }
 0x39c   : > { %v1902_v42 = vadd.f32 %v1333_v11, %v1069_v40 }
 0x39e   : > { %1107 = vmax.xlane.f32.xlu1 %v1902_v42  ;;  %1109 = vmax.xlane.f32.xlu0 %v1900_v41 }
 0x3a2   : > { %1111 = vmax.xlane.f32.xlu1 %v1906_v43 }
 0x409   : > { %v1086_v44 = vpop.xlane.xlu1 %1085 }
 0x40a   : > { %v1115_v45 = vsub.f32 %v1027_v13, %v1086_v44 }
 0x40b   : > { %v1082_v46 = vpop.xlane.xlu0 %1081 }
 0x40c   : > { %v1133_v47 = vmul.f32 1.442695, %v1115_v45  ;;  %v1113_v48 = vsub.f32 %v1019_v15, %v1082_v46 }
 0x40d   : > { %v1088_v49 = vpop.xlane.xlu1 %1087 }
 0x40e   : > { %1624 = vpow2.f32 %v1133_v47  ;;  %v1129_v50 = vmul.f32 1.442695, %v1113_v48  ;;  %v1116_v51 = vsub.f32 %v1030_v17, %v1088_v49 }
 0x40f   : > { %v1084_v52 = vpop.xlane.xlu0 %1083 }
 0x410   : > { %v1135_v53 = vmul.f32 1.442695, %v1116_v51  ;;  %v1114_v54 = vsub.f32 %v1022_v19, %v1084_v52  ;;  %1626 = vpow2.f32 %v1129_v50 }
 0x412   : > { %1628 = vpow2.f32 %v1135_v53  ;;  %v1131_v55 = vmul.f32 1.442695, %v1114_v54 }
 0x413   : > { %v1094_v56 = vpop.xlane.xlu0 %1093 }
 0x414   : > { %v1119_v57 = vsub.f32 %v1043_v22, %v1094_v56  ;;  %1630 = vpow2.f32 %v1131_v55 }
 0x415   : > { %v1096_v58 = vpop.xlane.xlu1 %1095 }
 0x416   : > { %v1141_v59 = vmul.f32 1.442695, %v1119_v57  ;;  %v1120_v60 = vsub.f32 %v1046_v24, %v1096_v58 }
 0x417   : > { %v1090_v61 = vpop.xlane.xlu0 %1089 }
 0x418   : > { %1632 = vpow2.f32 %v1141_v59  ;;  %v1143_v62 = vmul.f32 1.442695, %v1120_v60  ;;  %v1117_v63 = vsub.f32 %v1035_v26, %v1090_v61 }
 0x419   : > { %v1092_v0 = vpop.xlane.xlu1 %1091 }
 0x41a   : > { %1634 = vpow2.f32 %v1143_v62  ;;  %v1137_v1 = vmul.f32 1.442695, %v1117_v63  ;;  %v1118_v2 = vsub.f32 %v1038_v28, %v1092_v0 }
 0x41b   : > { %v1909_v3 = vpop.eup %1624  ;;  %v1102_v4 = vpop.xlane.xlu0 %1101 }
 0x41c   : > { %1636 = vpow2.f32 %v1137_v1  ;;  %v1139_v5 = vmul.f32 1.442695, %v1118_v2  ;;  %v1123_v6 = vsub.f32 %v1059_v30, %v1102_v4  ;;  %1165 = vadd.xlane.f32.xlu0 %v1909_v3 }
 0x41d   : > { %v1104_v7 = vpop.xlane.xlu1 %1103  ;;  %v1912_v8 = vpop.eup %1626 }
 0x41e   : > { %1638 = vpow2.f32 %v1139_v5  ;;  %v1149_v9 = vmul.f32 1.442695, %v1123_v6  ;;  %v1124_v10 = vsub.f32 %v1888_v32, %v1104_v7 }
 0x41f   : > { %v1915_v11 = vpop.eup %1628  ;;  %v1098_v12 = vpop.xlane.xlu0 %1097 }
 0x420   : > { %1640 = vpow2.f32 %v1149_v9  ;;  %v1151_v13 = vmul.f32 1.442695, %v1124_v10  ;;  %v1121_v14 = vsub.f32 %v1890_v34, %v1098_v12  ;;  %1167 = vadd.xlane.f32.xlu1 %v1915_v11  ;;  %1161 = vadd.xlane.f32.xlu0 %v1912_v8 }
 0x421   : > { %v1100_v15 = vpop.xlane.xlu1 %1099  ;;  %v1921_v18 = vpop.eup %1630 }
 0x422   : > { %1642 = vpow2.f32 %v1151_v13  ;;  %v1145_v16 = vmul.f32 1.442695, %v1121_v14  ;;  %v1122_v17 = vsub.f32 %v1893_v36, %v1100_v15 }
 0x423   : > { %v1106_v19 = vpop.xlane.xlu0 %1105 }
 0x424   : > { %1644 = vpow2.f32 %v1145_v16  ;;  %v1147_v20 = vmul.f32 1.442695, %v1122_v17  ;;  %v1125_v21 = vsub.f32 %v1896_v38, %v1106_v19  ;;  %1163 = vadd.xlane.f32.xlu1 %v1921_v18 }
 0x425   : > { %v1925_v22 = vpop.eup %1632 }
 0x426   : > { %1646 = vpow2.f32 %v1147_v20  ;;  %v1153_v23 = vmul.f32 1.442695, %v1125_v21  ;;  %1173 = vadd.xlane.f32.xlu0 %v1925_v22 }
 0x427   : > { %v1928_v24 = vpop.eup %1634  ;;  %v1108_v25 = vpop.xlane.xlu1 %1107 }
 0x428   : > { %v1110_v26 = vpop.xlane.xlu0 %1109  ;;  %1648 = vpow2.f32 %v1153_v23  ;;  %v1126_v27 = vsub.f32 %v1902_v42, %v1108_v25  ;;  %1175 = vadd.xlane.f32.xlu1 %v1928_v24 }
 0x429   : > { %v1127_v28 = vsub.f32 %v1900_v41, %v1110_v26  ;;  %v1933_v29 = vpop.eup %1636 }
 0x42a   : > { %v1155_v30 = vmul.f32 1.442695, %v1126_v27  ;;  %1169 = vadd.xlane.f32.xlu0 %v1933_v29 }
 0x42b   : > { %v1157_v31 = vmul.f32 1.442695, %v1127_v28  ;;  %v1936_v32 = vpop.eup %1638  ;;  %v1112_v33 = vpop.xlane.xlu1 %1111 }
 0x42c   : > { %1650 = vpow2.f32 %v1155_v30  ;;  %v1128_v34 = vsub.f32 %v1906_v43, %v1112_v33  ;;  %1171 = vadd.xlane.f32.xlu1 %v1936_v32 }
 0x42d   : > { %v1940_v35 = vpop.eup %1640  ;;  %1652 = vpow2.f32 %v1157_v31 }
 0x42e   : > { %v1159_v36 = vmul.f32 1.442695, %v1128_v34  ;;  %1181 = vadd.xlane.f32.xlu0 %v1940_v35 }
 0x42f   : > { %v1943_v37 = vpop.eup %1642 }
 0x430   : > { %1654 = vpow2.f32 %v1159_v36  ;;  %1183 = vadd.xlane.f32.xlu1 %v1943_v37 }
 0x431   : > { %v1946_v38 = vpop.eup %1644 }
 0x432   : > { %1177 = vadd.xlane.f32.xlu0 %v1946_v38 }
 0x433   : > { %v1949_v39 = vpop.eup %1646 }
 0x434   : > { %1179 = vadd.xlane.f32.xlu1 %v1949_v39 }
 0x435   : > { %v1952_v40 = vpop.eup %1648 }
 0x436   : > { %1185 = vadd.xlane.f32.xlu0 %v1952_v40 }
 0x439   : > { %v1955_v41 = vpop.eup %1650 }
 0x43a   : > { %v1957_v42 = vpop.eup %1652  ;;  %1187 = vadd.xlane.f32.xlu1 %v1955_v41 }
 0x43b   : > { %1189 = vadd.xlane.f32.xlu0 %v1957_v42 }
 0x43d   : > { %v1961_v43 = vpop.eup %1654 }
 0x43e   : > { %1191 = vadd.xlane.f32.xlu1 %v1961_v43 }
 0x4a5   : > { %v1166_v44 = vpop.xlane.xlu0 %1165 }
 0x4a6   : > { %1656 = vrcp.f32 %v1166_v44 }
 0x4a9   : > { %v1168_v45 = vpop.xlane.xlu1 %1167  ;;  %v1162_v46 = vpop.xlane.xlu0 %1161 }
 0x4aa   : > { %1658 = vrcp.f32 %v1168_v45 }
 0x4ab   : > { %1660 = vrcp.f32 %v1162_v46 }
 0x4ad   : > { %v1164_v47 = vpop.xlane.xlu1 %1163 }
 0x4ae   : > { %1662 = vrcp.f32 %v1164_v47 }
 0x4af   : > { %v1174_v48 = vpop.xlane.xlu0 %1173 }
 0x4b0   : > { %1664 = vrcp.f32 %v1174_v48 }
 0x4b1   : > { %v1176_v49 = vpop.xlane.xlu1 %1175 }
 0x4b2   : > { %1666 = vrcp.f32 %v1176_v49 }
 0x4b3   : > { %v1657_v50 = vpop.eup %1656  ;;  %v1170_v51 = vpop.xlane.xlu0 %1169 }
 0x4b4   : > { %v1211_v52 = vmul.f32 %v1657_v50, %v1909_v3  ;;  %1668 = vrcp.f32 %v1170_v51 }
 0x4b5   : > { %v1172_v53 = vpop.xlane.xlu1 %1171 }
 0x4b6   : > { %1227 = vst [vmem:[%s1969_s17 + $0x10] sm:$0xff] %v1211_v52  ;;  %1670 = vrcp.f32 %v1172_v53 }
 0x4b7   : > { %v1659_v54 = vpop.eup %1658  ;;  %v1182_v55 = vpop.xlane.xlu0 %1181 }
 0x4b8   : > { %v1661_v56 = vpop.eup %1660  ;;  %v1212_v57 = vmul.f32 %v1659_v54, %v1915_v11  ;;  %1672 = vrcp.f32 %v1182_v55 }
 0x4b9   : > { %v1209_v58 = vmul.f32 %v1661_v56, %v1912_v8  ;;  %v1184_v59 = vpop.xlane.xlu1 %1183 }
 0x4ba   : > { %1228 = vst [vmem:[%s1969_s17 + $0x18] sm:$0xff] %v1212_v57  ;;  %1674 = vrcp.f32 %v1184_v59 }
 0x4bb   : > { %v1663_v60 = vpop.eup %1662  ;;  %1225 = vst [vmem:[%s1969_s17] sm:$0xff] %v1209_v58  ;;  %v1178_v61 = vpop.xlane.xlu0 %1177 }
 0x4bc   : > { %v1210_v62 = vmul.f32 %v1663_v60, %v1921_v18  ;;  %1676 = vrcp.f32 %v1178_v61 }
 0x4bd   : > { %v1665_v63 = vpop.eup %1664  ;;  %v1180_v0 = vpop.xlane.xlu1 %1179 }
 0x4be   : > { %1226 = vst [vmem:[%s1969_s17 + $0x8] sm:$0xff] %v1210_v62  ;;  %v1215_v1 = vmul.f32 %v1665_v63, %v1925_v22  ;;  %1678 = vrcp.f32 %v1180_v0 }
 0x4bf   : > { %v1667_v2 = vpop.eup %1666  ;;  %v1186_v3 = vpop.xlane.xlu0 %1185 }
 0x4c0   : > { %1231 = vst [vmem:[%s1969_s17 + $0x30] sm:$0xff] %v1215_v1  ;;  %v1216_v4 = vmul.f32 %v1667_v2, %v1928_v24  ;;  %1680 = vrcp.f32 %v1186_v3 }
 0x4c1   : > { %v1669_v5 = vpop.eup %1668 }
 0x4c2   : > { %1232 = vst [vmem:[%s1969_s17 + $0x38] sm:$0xff] %v1216_v4  ;;  %v1213_v6 = vmul.f32 %v1669_v5, %v1933_v29 }
 0x4c3   : > { %v1671_v7 = vpop.eup %1670  ;;  %v1188_v8 = vpop.xlane.xlu1 %1187 }
 0x4c4   : > { %1229 = vst [vmem:[%s1969_s17 + $0x20] sm:$0xff] %v1213_v6  ;;  %v1214_v9 = vmul.f32 %v1671_v7, %v1936_v32  ;;  %1682 = vrcp.f32 %v1188_v8  ;;  %v1190_v10 = vpop.xlane.xlu0 %1189 }
 0x4c5   : > { %v1673_v11 = vpop.eup %1672  ;;  %1684 = vrcp.f32 %v1190_v10 }
 0x4c6   : > { %1230 = vst [vmem:[%s1969_s17 + $0x28] sm:$0xff] %v1214_v9  ;;  %v1219_v12 = vmul.f32 %v1673_v11, %v1940_v35 }
 0x4c7   : > { %v1675_v13 = vpop.eup %1674  ;;  %v1192_v14 = vpop.xlane.xlu1 %1191 }
 0x4c8   : > { %1235 = vst [vmem:[%s1969_s17 + $0x50] sm:$0xff] %v1219_v12  ;;  %v1220_v15 = vmul.f32 %v1675_v13, %v1943_v37  ;;  %1686 = vrcp.f32 %v1192_v14 }
 0x4c9   : > { %v1677_v16 = vpop.eup %1676 }
 0x4ca   : > { %1236 = vst [vmem:[%s1969_s17 + $0x58] sm:$0xff] %v1220_v15  ;;  %v1217_v17 = vmul.f32 %v1677_v16, %v1946_v38 }
 0x4cb   : > { %v1679_v18 = vpop.eup %1678 }
 0x4cc   : > { %1233 = vst [vmem:[%s1969_s17 + $0x40] sm:$0xff] %v1217_v17  ;;  %v1218_v19 = vmul.f32 %v1679_v18, %v1949_v39 }
 0x4cd   : > { %v1681_v20 = vpop.eup %1680 }
 0x4ce   : > { %1234 = vst [vmem:[%s1969_s17 + $0x48] sm:$0xff] %v1218_v19  ;;  %v1221_v21 = vmul.f32 %v1681_v20, %v1952_v40 }
 0x4d0   : > { %1237 = vst [vmem:[%s1969_s17 + $0x60] sm:$0xff] %v1221_v21 }
 0x4d1   : > { %v1683_v22 = vpop.eup %1682 }
 0x4d2   : > { %v1685_v23 = vpop.eup %1684  ;;  %v1222_v24 = vmul.f32 %v1683_v22, %v1955_v41 }
 0x4d3   : > { %v1223_v25 = vmul.f32 %v1685_v23, %v1957_v42 }
 0x4d4   : > { %1238 = vst [vmem:[%s1969_s17 + $0x68] sm:$0xff] %v1222_v24 }
 0x4d5   : > { %v1687_v26 = vpop.eup %1686  ;;  %1239 = vst [vmem:[%s1969_s17 + $0x70] sm:$0xff] %v1223_v25 }
 0x4d6   : > { %v1224_v27 = vmul.f32 %v1687_v26, %v1961_v43 }
 0x4d8   : > { %1240 = vst [vmem:[%s1969_s17 + $0x78] sm:$0xff] %v1224_v27 }
 0x4d9 PF: > { %s19_s30 = sadd.s32 1, %s1694_s30  }
 0x4da   : > { %p16_p4 = scmp.ge.s32.totalorder %s19_s30, 4  }
 0x4dc   :  { %18 = sbr.rel (!%p16_p4) target bundleno = 1 (0x1), region = 86 }

</bundles_post_ra>
